<compile_context>
chip_gen: v6e
topology: v6e:2x2x1
jax: 0.10.0
libtpu: 0.0.40
codegen_flags: <defaults>
</compile_context>

<pallas_src>
import jax
import jax.numpy as jnp
from jax.experimental import pallas as pl
from jax.experimental.pallas import tpu as pltpu


# --------------------------- small helpers ----------------------------------

def _round_up(x, m):
    return (x + m - 1) // m * m


def _round_down(x, m):
    return max(m, (x // m) * m)


def _cdiv(a, b):
    return (a + b - 1) // b


def _sublane_multiple(dtype):
    # Sub-32-bit dtypes pack along sublanes: 16 rows/vreg for bf16, 32 for int8/fp8.
    return max(8, 32 // jnp.dtype(dtype).itemsize)


def _vmem_capacity_bytes():
    try:
        return int(pltpu.get_tpu_info().vmem_capacity_bytes)
    except Exception:
        return 64 * (1 << 20)  # conservative default: v7x per-TC VMEM


# ------------------------------ kernels --------------------------------------

def _proj_head_kernel(x_ref, w_ref, b_ref, o_ref):
    # Whole-K matmul: native-dtype operands on the MXU, f32 accumulation.
    y = jnp.dot(x_ref[...], w_ref[...], preferred_element_type=jnp.float32)
    y = y + b_ref[...]                                 # bias: (1, p) f32 row
    # F.normalize(y, dim=1): y / max(||y||, 1e-12) == y * rsqrt(max(||y||^2, 1e-24))
    sq = jnp.sum(y * y, axis=1, keepdims=True)         # XLU reduce, (tb, 1)
    inv = jax.lax.rsqrt(jnp.maximum(sq, 1e-24))        # EUP, eps^2 = (1e-12)^2
    o_ref[...] = (y * inv).astype(o_ref.dtype)


def _proj_head_kernel_ktiled(x_ref, w_ref, b_ref, o_ref, acc_ref):
    # Large-d_model fallback: contraction tiled over grid axis 1 ("arbitrary").
    k = pl.program_id(1)

    @pl.when(k == 0)
    def _():
        acc_ref[...] = jnp.zeros_like(acc_ref)

    acc_ref[...] += jnp.dot(x_ref[...], w_ref[...],
                            preferred_element_type=jnp.float32)

    @pl.when(k == pl.num_programs(1) - 1)
    def _():
        y = acc_ref[...] + b_ref[...]
        sq = jnp.sum(y * y, axis=1, keepdims=True)
        inv = jax.lax.rsqrt(jnp.maximum(sq, 1e-24))
        o_ref[...] = (y * inv).astype(o_ref.dtype)


# ------------------------------ wrapper --------------------------------------

def projection_head(x, w_t, b, *, tb=None, tk=None):
    """Fused Linear + row L2-normalize.

    x   : (B, d_model)          activations (f32 or bf16)
    w_t : (d_model, proj_dim)   == PyTorch fc.weight.T
    b   : (proj_dim,)           fc.bias
    tk  : optional contraction tile; forces the K-tiled (accumulator) path.
    """
    B, d_model = x.shape
    dk, proj_dim = w_t.shape
    assert dk == d_model, "weight K dim must match x feature dim"

    out_dtype = x.dtype
    x_bytes = jnp.dtype(x.dtype).itemsize
    w_bytes = jnp.dtype(w_t.dtype).itemsize
    o_bytes = jnp.dtype(out_dtype).itemsize

    # Lane-dense output only when needed: pad proj_dim to 128 iff not already a
    # multiple (weight/bias pads are read-once; output slice is then the only
    # extra HBM pass and it scales with proj_dim, not d_model).
    p_pad = _round_up(proj_dim, 128)
    n_padded = p_pad != proj_dim

    cap = _vmem_capacity_bytes()
    budget = cap // 2                 # ~32 MiB on v7x, ~64 MiB on v5e/v6e
    mult = _sublane_multiple(out_dtype)

    # --- batch tile: as large as the budget allows, capped so there are >= 2
    # grid steps (lets the "parallel" axis split across v7x's two TCs). ---
    if tb is None:
        tb = min(512, _round_up(B, mult))
        tb = min(tb, _round_up(_cdiv(B, 2), mult))
    tb = max(mult, _round_up(tb, mult))

    def simple_footprint(t):
        return (2 * t * d_model * x_bytes          # x tile (double-buffered)
                + 2 * t * p_pad * o_bytes          # out tile (double-buffered)
                + 2 * d_model * p_pad * w_bytes    # resident weight (2 bufs)
                + 2 * p_pad * 4                    # bias
                + 2 * t * p_pad * 4)               # f32 intermediates headroom

    while simple_footprint(tb) > budget and tb > mult:
        tb = _round_down(tb // 2, mult)            # round DOWN: stay under budget

    use_k_tiling = (tk is not None) or (simple_footprint(tb) > budget)

    bp = b.astype(jnp.float32)
    if n_padded:
        bp = jnp.pad(bp, (0, p_pad - proj_dim))
    bp = bp.reshape(1, p_pad)

    if not use_k_tiling:
        # ---------------- resident-weight path (common case) ----------------
        xp = x                                     # never padded / copied
        wp = w_t if not n_padded else jnp.pad(w_t, ((0, 0), (0, p_pad - proj_dim)))

        nb = _cdiv(B, tb)
        footprint = simple_footprint(tb)
        kernel = _proj_head_kernel
        dim_sem = ("parallel",)
        grid_spec = pltpu.PrefetchScalarGridSpec(
            num_scalar_prefetch=0,
            grid=(nb,),
            in_specs=[
                pl.BlockSpec((tb, d_model), lambda i: (i, 0)),    # x: full-K block
                pl.BlockSpec((d_model, p_pad), lambda i: (0, 0)), # weight: resident
                pl.BlockSpec((1, p_pad), lambda i: (0, 0)),       # bias:   resident
            ],
            out_specs=pl.BlockSpec((tb, p_pad), lambda i: (i, 0)),
        )
    else:
        # ---------------- K-tiled fallback (huge d_model / forced) ----------
        if tk is None:
            tk = min(d_model, 2048)
        tk = min(_round_up(tk, 128), _round_up(d_model, 128))

        def ktiled_footprint(t, k):
            return (2 * t * k * x_bytes
                    + 2 * k * p_pad * w_bytes
                    + 2 * t * p_pad * o_bytes
                    + 2 * p_pad * 4
                    + 2 * t * p_pad * 4)           # f32 accumulator + epilogue temp

        while ktiled_footprint(tb, tk) > budget and tk > 128:
            tk = _round_down(tk // 2, 128)
        while ktiled_footprint(tb, tk) > budget and tb > mult:
            tb = _round_down(tb // 2, mult)

        d_k_pad = _round_up(d_model, tk)
        nk = d_k_pad // tk
        # Zero-pad along K only in this fallback so partial K blocks never feed
        # garbage into the accumulation (zero columns keep the row norm exact).
        xp = x if d_k_pad == d_model else jnp.pad(x, ((0, 0), (0, d_k_pad - d_model)))
        wp = w_t
        if d_k_pad != d_model or n_padded:
            wp = jnp.pad(w_t, ((0, d_k_pad - d_model), (0, p_pad - proj_dim)))

        nb = _cdiv(B, tb)
        footprint = ktiled_footprint(tb, tk)
        kernel = _proj_head_kernel_ktiled
        dim_sem = ("parallel", "arbitrary")
        grid_spec = pltpu.PrefetchScalarGridSpec(
            num_scalar_prefetch=0,
            grid=(nb, nk),
            in_specs=[
                pl.BlockSpec((tb, tk), lambda i, k: (i, k)),
                pl.BlockSpec((tk, p_pad), lambda i, k: (k, 0)),
                pl.BlockSpec((1, p_pad), lambda i, k: (0, 0)),
            ],
            out_specs=pl.BlockSpec((tb, p_pad), lambda i, k: (i, 0)),
            scratch_shapes=[pltpu.VMEM((tb, p_pad), jnp.float32)],
        )

    # vmem_limit: actual footprint + small headroom; never the full physical VMEM.
    vmem_limit = int(min(max(footprint + 2 * (1 << 20), 4 * (1 << 20)),
                         (3 * cap) // 4))

    cost = pl.CostEstimate(
        flops=2 * B * d_model * p_pad,
        transcendentals=B,                         # one rsqrt per row
        bytes_accessed=(B * d_model * x_bytes
                        + d_model * p_pad * w_bytes
                        + p_pad * 4
                        + B * p_pad * o_bytes),
    )

    out = pl.pallas_call(
        kernel,
        out_shape=jax.ShapeDtypeStruct((B, p_pad), out_dtype),
        grid_spec=grid_spec,
        compiler_params=pltpu.CompilerParams(
            dimension_semantics=dim_sem,
            vmem_limit_bytes=vmem_limit,
        ),
        cost_estimate=cost,
    )(xp, wp, bp)

    if n_padded:
        out = out[:, :proj_dim]                    # no-op when proj_dim % 128 == 0
    return out


# ------------------------------ reference ------------------------------------

def reference(x, w_t, b):
    y = x.astype(jnp.float32) @ w_t.astype(jnp.float32) + b.astype(jnp.float32)
    n = jnp.maximum(jnp.sqrt(jnp.sum(y * y, axis=1, keepdims=True)), 1e-12)
    return y / n


if __name__ == "__main__":
    key = jax.random.PRNGKey(0)

    def make_params(kw, kb, d_model, proj_dim, dtype):
        # PyTorch nn.Linear-style uniform init; stored transposed: (d_model, proj_dim).
        bound = 1.0 / (d_model ** 0.5)
        w_t = jax.random.uniform(kw, (d_model, proj_dim), jnp.float32, -bound, bound)
        bias = jax.random.uniform(kb, (proj_dim,), jnp.float32, -bound, bound)
        return w_t.astype(dtype), bias

    # --- Test 1: module-scale shapes, f32, resident-weight path. ---
    batch, d_model, proj_dim = 8, 32, 16
    k1, k2, k3, key = jax.random.split(key, 4)
    w_t, bias = make_params(k1, k2, d_model, proj_dim, jnp.float32)
    x = jax.random.normal(k3, (batch, d_model), jnp.float32)

    out = jax.block_until_ready(projection_head(x, w_t, bias))
    ref = reference(x, w_t, bias)
    assert out.shape == (batch, proj_dim)
    assert jnp.allclose(out, ref, atol=1e-5, rtol=1e-5), "f32 mismatch vs reference"

    # --- Test 2: partial last batch block + forced K-tiled accumulator path. ---
    batch, d_model, proj_dim = 20, 256, 128        # B % tb != 0, nk == 2
    k1, k2, k3, key = jax.random.split(key, 4)
    w_t, bias = make_params(k1, k2, d_model, proj_dim, jnp.float32)
    x = jax.random.normal(k3, (batch, d_model), jnp.float32)

    out = jax.block_until_ready(projection_head(x, w_t, bias, tk=128))
    ref = reference(x, w_t, bias)
    assert out.shape == (batch, proj_dim)
    assert jnp.allclose(out, ref, atol=1e-5, rtol=1e-5), "K-tiled mismatch vs reference"

    # --- Test 3: bf16 activations/weights (halved HBM traffic, f32 accumulation).
    # bf16 operands deviate slightly from the f32-upcast PyTorch reference.
    xb, wb = x.astype(jnp.bfloat16), w_t.astype(jnp.bfloat16)
    outb = jax.block_until_ready(projection_head(xb, wb, bias))
    refb = reference(xb.astype(jnp.float32), wb.astype(jnp.float32), bias)
    assert outb.shape == (batch, proj_dim)
    assert jnp.allclose(outb.astype(jnp.float32), refb, atol=2e-2, rtol=2e-2), \
        "bf16 mismatch vs reference"

    print("KERNEL_OK")
</pallas_src>

<mosaic_0001>
module attributes {stable_mosaic.version = 11 : i64} {
  func.func @_proj_head_kernel(%arg0: i32, %arg1: memref<8x32xf32, #tpu.memory_space<vmem>>, %arg2: memref<32x128xf32, #tpu.memory_space<vmem>>, %arg3: memref<1x128xf32, #tpu.memory_space<vmem>>, %arg4: memref<8x128xf32, #tpu.memory_space<vmem>>) attributes {dimension_semantics = [#tpu.dimension_semantics<parallel>], iteration_bounds = array<i64: 1>, scalar_prefetch = 0 : i64, scratch_operands = 0 : i64, tpu.core_type = #tpu.core_type<tc>, window_params = [{transform_indices = @transform_0, window_bounds = array<i64: 8, 32>}, {pipeline_mode = #tpu.pipeline_mode<synchronous>, transform_indices = @transform_1, window_bounds = array<i64: 32, 128>}, {pipeline_mode = #tpu.pipeline_mode<synchronous>, transform_indices = @transform_2, window_bounds = array<i64: 1, 128>}, {transform_indices = @transform_3, window_bounds = array<i64: 8, 128>}]} {
    %c0 = arith.constant 0 : index
    %c0_0 = arith.constant 0 : index
    %0 = vector.load %arg1[%c0, %c0_0] : memref<8x32xf32, #tpu.memory_space<vmem>>, vector<8x32xf32>
    %c0_1 = arith.constant 0 : index
    %c0_2 = arith.constant 0 : index
    %1 = vector.load %arg2[%c0_1, %c0_2] : memref<32x128xf32, #tpu.memory_space<vmem>>, vector<32x128xf32>
    %cst = arith.constant dense<0.000000e+00> : vector<8x128xf32>
    %2 = tpu.matmul %0, %1, %cst {dimension_numbers = #tpu.dot_dimension_numbers<[1], [0], [0], [1], [0, 0, 1, 1], [], []>} : vector<8x32xf32>, vector<32x128xf32>, vector<8x128xf32> -> vector<8x128xf32>
    %c0_3 = arith.constant 0 : index
    %c0_4 = arith.constant 0 : index
    %3 = vector.load %arg3[%c0_3, %c0_4] : memref<1x128xf32, #tpu.memory_space<vmem>>, vector<1x128xf32>
    %4 = vector.broadcast %3 : vector<1x128xf32> to vector<8x128xf32>
    %5 = arith.addf %2, %4 : vector<8x128xf32>
    %6 = arith.mulf %5, %5 : vector<8x128xf32>
    %cst_5 = arith.constant dense<0.000000e+00> : vector<8xf32>
    %7 = vector.multi_reduction <add>, %6, %cst_5 [1] : vector<8x128xf32> to vector<8xf32>
    %8 = vector.shape_cast %7 : vector<8xf32> to vector<8x1xf32>
    %cst_6 = arith.constant 1.000000e-24 : f32
    %9 = vector.broadcast %cst_6 : f32 to vector<8x1xf32>
    %10 = arith.maximumf %8, %9 : vector<8x1xf32>
    %11 = math.rsqrt %10 : vector<8x1xf32>
    %12 = vector.broadcast %11 : vector<8x1xf32> to vector<8x128xf32>
    %13 = arith.mulf %5, %12 : vector<8x128xf32>
    %c0_7 = arith.constant 0 : index
    %c0_8 = arith.constant 0 : index
    %14 = vector.load %arg4[%c0_7, %c0_8] : memref<8x128xf32, #tpu.memory_space<vmem>>, vector<8x128xf32>
    tpu.vector_store %arg4[%c0_7, %c0_8], %13 {strides = array<i32>} : memref<8x128xf32, #tpu.memory_space<vmem>>, vector<8x128xf32>,
    return
  }
  func.func @transform_0(%arg0: i32) -> (i32, i32) {
    %c0_i32 = arith.constant 0 : i32
    %c0_i32_0 = arith.constant 0 : i32
    return %arg0, %c0_i32 : i32, i32
  }
  func.func @transform_1(%arg0: i32) -> (i32, i32) {
    %c0_i32 = arith.constant 0 : i32
    %c0_i32_0 = arith.constant 0 : i32
    %c0_i32_1 = arith.constant 0 : i32
    return %c0_i32, %c0_i32_0 : i32, i32
  }
  func.func @transform_2(%arg0: i32) -> (i32, i32) {
    %c0_i32 = arith.constant 0 : i32
    %c0_i32_0 = arith.constant 0 : i32
    %c0_i32_1 = arith.constant 0 : i32
    return %c0_i32, %c0_i32_0 : i32, i32
  }
  func.func @transform_3(%arg0: i32) -> (i32, i32) {
    %c0_i32 = arith.constant 0 : i32
    %c0_i32_0 = arith.constant 0 : i32
    return %arg0, %c0_i32 : i32, i32
  }
}

</mosaic_0001>

<bundles_post_ra>
// kernel: tpu_custom_call.1
= control target key start
LH: loop header
LB: loop body
LE: loop exit
PB: predicated region body
PF: predicated region fallthrough
CT: control target
= control target key end

     0   :  { %8 = vsyncpa [#allocation3], 0  ;;  %s282_s0 = inlined_call_operand.hbm [shape: f32[8,32], index: 0, kind: input, shape index: {}]   ;;  %s283_s1 = inlined_call_operand.hbm [shape: f32[32,128], index: 1, kind: input, shape index: {}]   ;;  %s284_s2 = inlined_call_operand.vmem [shape: f32[1,128], index: 2, kind: input, shape index: {}]   ;;  %s285_s3 = inlined_call_operand.hbm [shape: f32[8,128], index: 3, kind: output, shape index: {}]  }
   0x1   :  { %9 = vsyncpa [#allocation6], 0 }
   0x2   :  { %10 = vsyncpa [#allocation4], 0  ;;  %s243_s12 = smov [#allocation2]   ;;  %s244_s14 = smov [#allocation5]  }
   0x3   :  { %s17_s13 = sshll.u32 %s243_s12, 4  ;;  %s26_s15 = sshll.u32 %s244_s14, 4  ;;  %s18_s13 = int_to_ptr.vmem [resolvable:$true] %s17_s13  ;;  %s27_s15 = int_to_ptr.vmem [resolvable:$true] %s26_s15 }
   0x4   :  { %s185_s16 = scalar_lea.vmem %s18_s13, 128  ;;  %p190_p1 = scmp.lt.s32.totalorder %s18_s13, %s18_s13 }
   0x5   :  { %p186_p0 = scmp.ne.s32.totalorder %s18_s13, %s185_s16  ;;  %p191_p2 = scmp.lt.s32.totalorder %s185_s16, %s185_s16 }
   0x7   :  { %p192_p3 = por %p191_p2, %p190_p1 }
   0x9   :  { %p193_p4 = pnand %p192_p3, %p186_p0 }
   0xb   :  { %196 = shalt.err (!%p193_p4)
}
   0xc   :  { %20 = dma.hbm_to_vmem [thread:$0]  %s282_s0, 128, %s18_s13, [#allocation3]  }
   0xd   :  { %s205_s19 = scalar_lea.vmem %s27_s15, 512  ;;  %p210_p6 = scmp.lt.s32.totalorder %s27_s15, %s27_s15 }
   0xe   :  { %p206_p5 = scmp.ne.s32.totalorder %s27_s15, %s205_s19  ;;  %p211_p7 = scmp.lt.s32.totalorder %s205_s19, %s205_s19 }
  0x10   :  { %p212_p8 = por %p211_p7, %p210_p6 }
  0x12   :  { %p213_p9 = pnand %p212_p8, %p206_p5 }
  0x14   :  { %216 = shalt.err (!%p213_p9)
}
  0x15   :  { %s245_s20 = smov 128   ;;  %s246_s21 = smov 8  }
  0x16   :  { %32 = dma.hbm_to_vmem [thread:$0]  %s283_s1, 512, %s27_s15, [#allocation6], %s245_s20, %s245_s20, %s246_s21  }
  0x17   :  { %237 = dma.done.wait [#allocation3], 128  }
  0x18   :  { %238 = vsyncadd [#allocation3], 4294967168 }
  0x19   :  { %239 = dma.done.wait [#allocation6], 512  }
  0x1a   :  { %240 = vsyncadd [#allocation6], 4294966784  ;;  %v247_v0 = vmov 0.0   ;;  %vm248_vm0 = vmmov 0   ;;  %v45_v1 = vld [vmem:[#allocation5 + $0x18] sm:$0xff]  ;;  %v44_v2 = vld [vmem:[#allocation5 + $0x10] sm:$0xff] }
  0x1b   :  { %157 = vmatprep.subr.mxu0 %v247_v0  ;;  %165 = vmatprep.mubr.msk.f32.mxu0 %vm248_vm0, %v247_v0  ;;  %v43_v3 = vld [vmem:[#allocation5 + $0x8] sm:$0xff]  ;;  %v42_v4 = vld [vmem:[#allocation5] sm:$0xff]  ;;  %v41_v5 = vld [vmem:[#allocation2] sm:$0xff]  ;;  %vm53_vm1 = vcmask 261120   ;;  %s249_s24 = smov [#allocation7]  }
  0x1c   :  { %158 = vmatpush3.msra.mxu0 %v45_v1  ;;  %v150_v6 = vld [vmem:[%s284_s2] ss:$0 sm:$0xff]  ;;  %s140_s25 = sshll.u32 %s249_s24, 4  ;;  %s141_s25 = int_to_ptr.vmem [resolvable:$true] %s140_s25 }
  0x1d   :  { %159 = vmatprep.subr.mxu0 %v247_v0  ;;  %s217_s26 = scalar_lea.vmem %s141_s25, 128  ;;  %p222_p11 = scmp.lt.s32.totalorder %s141_s25, %s141_s25 }
  0x1e   :  { %160 = vmatpush3.msra.mxu0 %v44_v2  ;;  %p218_p10 = scmp.ne.s32.totalorder %s141_s25, %s217_s26  ;;  %p223_p12 = scmp.lt.s32.totalorder %s217_s26, %s217_s26 }
  0x1f   :  { %161 = vmatprep.subr.mxu0 %v247_v0 }
  0x20   :  { %162 = vmatpush3.msra.mxu0 %v43_v3  ;;  %p224_p13 = por %p223_p12, %p222_p11 }
  0x21   :  { %163 = vmatprep.subr.mxu0 %v247_v0 }
  0x22   :  { %164 = vmatpush3.msra.mxu0 %v42_v4  ;;  %p225_p0 = pnand %p224_p13, %p218_p10 }
  0x23   :  { %166 = vmatmul.mubr.msk.f32.vlgmr.msra.gmra.mxu0 %vm53_vm1, %v41_v5 }
  0xe3   :  { %v123_v7 = vpop.f32.mrf.mxu0 }
  0xe4   :  { %v124_v8 = vadd.f32 %v150_v6, %v123_v7 }
  0xe5   :  { %v167_v9 = vpop.f32.mrf.mxu0 }
  0xe6   :  { %v127_v10 = vmul.f32 %v124_v8, %v124_v8 }
  0xe8   :  { %128 = vadd.xlane.f32.xlu0 %v127_v10 }
 0x171   :  { %v129_v11 = vpop.xlane.xlu0 %128 }
 0x172   :  { %v130_v12 = vmax.f32 %v129_v11, 1e-24 }
 0x174   :  { %175 = vrsqrt.f32 %v130_v12 }
 0x181   :  { %v176_v13 = vpop.eup %175 }
 0x182   :  { %v132_v14 = vmul.f32 %v176_v13, %v124_v8 }
 0x184   :  { %133 = vst [vmem:[#allocation7] sm:$0xff] %v132_v14 }
 0x185   :  { %228 = shalt.err (!%p225_p0)
}
 0x186   :  { %143 = dma.vmem_to_hbm [thread:$0]  %s141_s25, 128, %s285_s3, [#allocation4]  }
 0x187   :  { %241 = dma.done.wait [#allocation4], 128  }
 0x188   :  { %242 = vsyncadd [#allocation4], 4294967168 }
 0x189   :  { %147 = vsyncpa [#allocation3], 1 }
 0x18a   :  { %148 = vsyncpa [#allocation6], 1 }
 0x18b   :  { %149 = vsyncpa [#allocation4], 1 }

</bundles_post_ra>
